<compile_context>
chip_gen: v6e
topology: v6e:2x2x1
jax: 0.10.0
libtpu: 0.0.40
codegen_flags: <defaults>
</compile_context>

<pallas_src>
import jax
import jax.numpy as jnp
from jax import lax
from jax.experimental import pallas as pl
from jax.experimental.pallas import tpu as pltpu

_LANE = 128


def _mlp_kernel(x_ref, w1_ref, b1_ref, w2_ref, b2_ref, o_ref):
    x = x_ref[...]                     # (F, Tb)   batch on lanes
    w1 = w1_ref[...]                   # (H, F)
    if w1.shape[1] == 1:
        # F == 1: outer product -> pure VPU broadcast multiply (no MXU).
        h = w1 * x                     # (H,1)*(1,Tb) -> (H,Tb)
    else:
        h = jnp.dot(w1, x, preferred_element_type=jnp.float32)
    h = jnp.maximum(h + b1_ref[...], 0.0)          # bias + ReLU, f32 on VPU

    w2 = w2_ref[...]                   # (H, O)
    if w2.shape[1] == 1:
        # O == 1: dot-product per row -> VPU multiply + sublane (XLU) reduce.
        y = jnp.sum(h * w2, axis=0, keepdims=True)  # (1, Tb)
    else:
        # Contract over H without an explicit transpose: (H,O) x (H,Tb) -> (O,Tb)
        y = lax.dot_general(w2, h, (((0,), (0,)), ((), ())),
                            preferred_element_type=jnp.float32)
    o_ref[...] = (y + b2_ref[...]).astype(o_ref.dtype)


def _round_up(n, m):
    return ((n + m - 1) // m) * m


def _choose_tile_b(B, F, O):
    """Lane-dimension batch tile: multiple of 128, budgeted by bytes."""
    # Double-buffered x + out tiles (f32) must stay well inside the smallest
    # scoped-VMEM default (16 MiB on v5e), leaving room for resident weights.
    budget_bytes = 4 * 1024 * 1024
    per_col_bytes = 2 * (F + O) * 4
    max_tile = max(_LANE, (budget_bytes // per_col_bytes) // _LANE * _LANE)
    max_tile = min(max_tile, 64 * 1024)            # diminishing returns past 64K lanes
    # v7x has 2 TensorCores: once there is at least one full lane-tile per core,
    # make sure the "parallel" batch axis has >= 2 blocks to shard.
    if B >= 2 * _LANE:
        max_tile = min(max_tile, max(_LANE, _round_up(pl.cdiv(B, 2), _LANE)))
    return min(max_tile, _round_up(B, _LANE))


@jax.jit
def net_forward(x, w1, b1, w2, b2):
    """Pallas forward for Net: y = relu(x @ w1 + b1) @ w2 + b2.

    x : (B, F) float32
    w1: (F, H)   b1: (H,)
    w2: (H, O)   b2: (O,)
    Returns (B, O) float32.
    """
    B, F = x.shape
    H = w1.shape[1]
    O = w2.shape[1]

    # Layout plumbing (wrapper-side, fuses under jit): batch -> lane axis.
    x_t = x.T                          # (F, B); metadata-only when F == 1
    w1_t = w1.T                        # (H, F)
    b1_c = b1.reshape(H, 1)
    b2_c = b2.reshape(O, 1)
    # w2 is already (H, O) -- exactly what the sublane-reduce path wants.

    tile_b = _choose_tile_b(B, F, O)
    num_blocks = pl.cdiv(B, tile_b)
    b_pad = num_blocks * tile_b
    if b_pad != B:
        x_t = jnp.pad(x_t, ((0, 0), (0, b_pad - B)))   # pad ragged batch, slice out below

    cost = pl.CostEstimate(
        flops=2 * B * (F * H + H * O),
        transcendentals=0,
        bytes_accessed=4 * (B * F + F * H + H + H * O + O + B * O),
    )

    out_t = pl.pallas_call(
        _mlp_kernel,
        out_shape=jax.ShapeDtypeStruct((O, b_pad), jnp.float32),
        grid=(num_blocks,),
        in_specs=[
            pl.BlockSpec((F, tile_b), lambda i: (0, i)),   # x: lane-tiled over batch
            pl.BlockSpec((H, F), lambda i: (0, 0)),        # W1: VMEM-resident
            pl.BlockSpec((H, 1), lambda i: (0, 0)),        # b1
            pl.BlockSpec((H, O), lambda i: (0, 0)),        # W2
            pl.BlockSpec((O, 1), lambda i: (0, 0)),        # b2
        ],
        out_specs=pl.BlockSpec((O, tile_b), lambda i: (0, i)),  # lane-dense output
        compiler_params=pltpu.CompilerParams(
            dimension_semantics=("parallel",),             # shards batch blocks across TCs (v7x)
        ),
        cost_estimate=cost,
    )(x_t, w1_t, b1_c, w2, b2_c)

    return out_t[:, :B].T              # (B, O); slice off padding, back to row layout


def init_params(key, n_feature, n_hidden, n_output):
    """Deterministic PyTorch-style init: U(-1/sqrt(fan_in), 1/sqrt(fan_in))."""
    k1, k2, k3, k4 = jax.random.split(key, 4)
    bound1 = 1.0 / jnp.sqrt(jnp.float32(n_feature))
    bound2 = 1.0 / jnp.sqrt(jnp.float32(n_hidden))
    w1 = jax.random.uniform(k1, (n_feature, n_hidden), jnp.float32, -bound1, bound1)
    b1 = jax.random.uniform(k2, (n_hidden,), jnp.float32, -bound1, bound1)
    w2 = jax.random.uniform(k3, (n_hidden, n_output), jnp.float32, -bound2, bound2)
    b2 = jax.random.uniform(k4, (n_output,), jnp.float32, -bound2, bound2)
    return w1, b1, w2, b2


if __name__ == "__main__":
    # Matches the reference script: x = linspace(11, 48, 38).unsqueeze(1) -> (38, 1),
    # Net(n_feature=1, n_hidden=32, n_output=1).
    n_feature, n_hidden, n_output = 1, 32, 1
    key = jax.random.PRNGKey(0)
    w1, b1, w2, b2 = init_params(key, n_feature, n_hidden, n_output)

    x = jnp.linspace(11.0, 48.0, 38, dtype=jnp.float32).reshape(-1, 1)

    out = jax.block_until_ready(net_forward(x, w1, b1, w2, b2))

    # Pure-JAX reference check.
    ref = jnp.maximum(x @ w1 + b1, 0.0) @ w2 + b2
    assert out.shape == (38, 1), out.shape
    assert jnp.allclose(out, ref, atol=1e-4, rtol=1e-4), "mismatch vs reference"

    print("KERNEL_OK")
</pallas_src>

<mosaic_0001>
module attributes {stable_mosaic.version = 11 : i64} {
  func.func @_mlp_kernel(%arg0: i32, %arg1: memref<1x128xf32, #tpu.memory_space<vmem>>, %arg2: memref<32x1xf32, #tpu.memory_space<vmem>>, %arg3: memref<32x1xf32, #tpu.memory_space<vmem>>, %arg4: memref<32x1xf32, #tpu.memory_space<vmem>>, %arg5: memref<1x1xf32, #tpu.memory_space<vmem>>, %arg6: memref<1x128xf32, #tpu.memory_space<vmem>>) attributes {dimension_semantics = [#tpu.dimension_semantics<parallel>], iteration_bounds = array<i64: 1>, scalar_prefetch = 0 : i64, scratch_operands = 0 : i64, tpu.core_type = #tpu.core_type<tc>, window_params = [{transform_indices = @transform_0, window_bounds = array<i64: 1, 128>}, {pipeline_mode = #tpu.pipeline_mode<synchronous>, transform_indices = @transform_1, window_bounds = array<i64: 32, 1>}, {pipeline_mode = #tpu.pipeline_mode<synchronous>, transform_indices = @transform_2, window_bounds = array<i64: 32, 1>}, {pipeline_mode = #tpu.pipeline_mode<synchronous>, transform_indices = @transform_3, window_bounds = array<i64: 32, 1>}, {pipeline_mode = #tpu.pipeline_mode<synchronous>, transform_indices = @transform_4, window_bounds = array<i64: 1, 1>}, {transform_indices = @transform_5, window_bounds = array<i64: 1, 128>}]} {
    %c0 = arith.constant 0 : index
    %c0_0 = arith.constant 0 : index
    %0 = vector.load %arg1[%c0, %c0_0] : memref<1x128xf32, #tpu.memory_space<vmem>>, vector<1x128xf32>
    %c0_1 = arith.constant 0 : index
    %c0_2 = arith.constant 0 : index
    %1 = vector.load %arg2[%c0_1, %c0_2] : memref<32x1xf32, #tpu.memory_space<vmem>>, vector<32x1xf32>
    %2 = vector.broadcast %1 : vector<32x1xf32> to vector<32x128xf32>
    %3 = vector.broadcast %0 : vector<1x128xf32> to vector<32x128xf32>
    %4 = arith.mulf %2, %3 : vector<32x128xf32>
    %c0_3 = arith.constant 0 : index
    %c0_4 = arith.constant 0 : index
    %5 = vector.load %arg3[%c0_3, %c0_4] : memref<32x1xf32, #tpu.memory_space<vmem>>, vector<32x1xf32>
    %6 = vector.broadcast %5 : vector<32x1xf32> to vector<32x128xf32>
    %7 = arith.addf %4, %6 : vector<32x128xf32>
    %cst = arith.constant 0.000000e+00 : f32
    %8 = vector.broadcast %cst : f32 to vector<32x128xf32>
    %9 = arith.maximumf %7, %8 : vector<32x128xf32>
    %c0_5 = arith.constant 0 : index
    %c0_6 = arith.constant 0 : index
    %10 = vector.load %arg4[%c0_5, %c0_6] : memref<32x1xf32, #tpu.memory_space<vmem>>, vector<32x1xf32>
    %11 = vector.broadcast %10 : vector<32x1xf32> to vector<32x128xf32>
    %12 = arith.mulf %9, %11 : vector<32x128xf32>
    %cst_7 = arith.constant dense<0.000000e+00> : vector<128xf32>
    %13 = vector.multi_reduction <add>, %12, %cst_7 [0] : vector<32x128xf32> to vector<128xf32>
    %14 = vector.shape_cast %13 : vector<128xf32> to vector<1x128xf32>
    %c0_8 = arith.constant 0 : index
    %c0_9 = arith.constant 0 : index
    %15 = vector.load %arg5[%c0_8, %c0_9] : memref<1x1xf32, #tpu.memory_space<vmem>>, vector<1x1xf32>
    %16 = vector.broadcast %15 : vector<1x1xf32> to vector<1x128xf32>
    %17 = arith.addf %14, %16 : vector<1x128xf32>
    %c0_10 = arith.constant 0 : index
    %c0_11 = arith.constant 0 : index
    %18 = vector.load %arg6[%c0_10, %c0_11] : memref<1x128xf32, #tpu.memory_space<vmem>>, vector<1x128xf32>
    tpu.vector_store %arg6[%c0_10, %c0_11], %17 {strides = array<i32>} : memref<1x128xf32, #tpu.memory_space<vmem>>, vector<1x128xf32>,
    return
  }
  func.func @transform_0(%arg0: i32) -> (i32, i32) {
    %c0_i32 = arith.constant 0 : i32
    %c0_i32_0 = arith.constant 0 : i32
    return %c0_i32, %arg0 : i32, i32
  }
  func.func @transform_1(%arg0: i32) -> (i32, i32) {
    %c0_i32 = arith.constant 0 : i32
    %c0_i32_0 = arith.constant 0 : i32
    %c0_i32_1 = arith.constant 0 : i32
    return %c0_i32, %c0_i32_0 : i32, i32
  }
  func.func @transform_2(%arg0: i32) -> (i32, i32) {
    %c0_i32 = arith.constant 0 : i32
    %c0_i32_0 = arith.constant 0 : i32
    %c0_i32_1 = arith.constant 0 : i32
    return %c0_i32, %c0_i32_0 : i32, i32
  }
  func.func @transform_3(%arg0: i32) -> (i32, i32) {
    %c0_i32 = arith.constant 0 : i32
    %c0_i32_0 = arith.constant 0 : i32
    %c0_i32_1 = arith.constant 0 : i32
    return %c0_i32, %c0_i32_0 : i32, i32
  }
  func.func @transform_4(%arg0: i32) -> (i32, i32) {
    %c0_i32 = arith.constant 0 : i32
    %c0_i32_0 = arith.constant 0 : i32
    %c0_i32_1 = arith.constant 0 : i32
    return %c0_i32, %c0_i32_0 : i32, i32
  }
  func.func @transform_5(%arg0: i32) -> (i32, i32) {
    %c0_i32 = arith.constant 0 : i32
    %c0_i32_0 = arith.constant 0 : i32
    return %c0_i32, %arg0 : i32, i32
  }
}

</mosaic_0001>

<bundles_post_ra>
// kernel: net_forward.1
= control target key start
LH: loop header
LB: loop body
LE: loop exit
PB: predicated region body
PF: predicated region fallthrough
CT: control target
= control target key end

     0   :  { %v146_v0 = vmov 0   ;;  %v132_v47 = vlaneseq  ;;  %s222_s1 = inlined_call_operand.vmem [shape: f32[32,1], index: 1, kind: input, shape index: {}]   ;;  %s223_s2 = inlined_call_operand.vmem [shape: f32[32,1], index: 2, kind: input, shape index: {}]   ;;  %s224_s4 = inlined_call_operand.<no memory space> [shape: f32[1,1], index: 4, kind: input, shape index: {}]   ;;  %s225_s3 = inlined_call_operand.vmem [shape: f32[32,1], index: 3, kind: input, shape index: {}]   ;;  %s226_s0 = inlined_call_operand.vmem [shape: f32[1,128], index: 0, kind: input, shape index: {}]   ;;  %s227_s5 = inlined_call_operand.vmem [shape: f32[1,128], index: 5, kind: output, shape index: {}]  }
   0x1   :  { %145 = vset.pattern.permute.xlu1 %v146_v0  ;;  %144 = vset.pattern.permute.xlu0 %v146_v0  ;;  %v25_v1 = vld [vmem:[%s222_s1 + $0x10] sm:$0xff]  ;;  %v23_v2 = vld [vmem:[%s222_s1] sm:$0xff]  ;;  %v10_v3 = vstv %s224_s4  ;;  %v24_v5 = vld [vmem:[%s222_s1 + $0x8] sm:$0xff] }
   0x2   :  { %39 = vperm.xlu1 %145, %v25_v1   ;;  %29 = vperm.xlu0 %144, %v23_v2   ;;  %11 = vst [vmem:[#allocation2] sm:$0x1] %v10_v3  ;;  %v57_v4 = vld [vmem:[%s223_s2] sm:$0xff]  ;;  %v26_v6 = vld [vmem:[%s222_s1 + $0x18] sm:$0xff]  ;;  %v58_v7 = vld [vmem:[%s223_s2 + $0x8] sm:$0xff]  ;;  %v133_v50 = vshrl.u32 %v132_v47, 7 }
   0x3   :  { %v60_v8 = vld [vmem:[%s223_s2 + $0x18] sm:$0xff]  ;;  %v59_v9 = vld [vmem:[%s223_s2 + $0x10] sm:$0xff]  ;;  %v90_v10 = vld [vmem:[%s225_s3 + $0x8] sm:$0xff] }
   0x4   :  { %v89_v11 = vld [vmem:[%s225_s3] sm:$0xff]  ;;  %v92_v12 = vld [vmem:[%s225_s3 + $0x18] sm:$0xff]  ;;  %v91_v13 = vld [vmem:[%s225_s3 + $0x10] sm:$0xff]  ;;  %v134_v52 = vsub.s32 0, %v133_v50 }
   0x5   :  { %v142_v19 = vld [vmem:[%s226_s0] ss:$0 sm:$0xff] }
   0x6   :  { %63 = vperm.xlu1 %145, %v57_v4   ;;  %34 = vperm.xlu0 %144, %v24_v5  }
   0x9   :  { %v126_v14 = vld [vmem:[#allocation2] sm:$0x1] }
   0xa   :  { %44 = vperm.xlu1 %145, %v26_v6   ;;  %68 = vperm.xlu0 %144, %v58_v7  }
   0xe   :  { %78 = vperm.xlu1 %145, %v60_v8   ;;  %73 = vperm.xlu0 %144, %v59_v9  }
  0x12   :  { %100 = vperm.xlu1 %145, %v90_v10   ;;  %95 = vperm.xlu0 %144, %v89_v11  }
  0x16   :  { %110 = vperm.xlu1 %145, %v92_v12   ;;  %105 = vperm.xlu0 %144, %v91_v13  }
  0x1a   :  { %129 = vperm.xlu0 %144, %v126_v14  }
  0x7d   :  { %v40_v15 = vpop.permute.xlu1 %39  ;;  %v30_v16 = vpop.permute.xlu0 %29 }
  0x7e   :  { %v53_v22 = vmul.f32 %v142_v19, %v30_v16  ;;  %v55_v28 = vmul.f32 %v142_v19, %v40_v15 }
  0x81   :  { %v64_v17 = vpop.permute.xlu1 %63  ;;  %v35_v18 = vpop.permute.xlu0 %34 }
  0x82   :  { %v54_v23 = vmul.f32 %v142_v19, %v35_v18  ;;  %v81_v24 = vadd.f32 %v64_v17, %v53_v22 }
  0x84   :  { %v85_v29 = vmax.f32 %v81_v24, 0.0 }
  0x85   :  { %v45_v20 = vpop.permute.xlu1 %44  ;;  %v69_v21 = vpop.permute.xlu0 %68 }
  0x86   :  { %v82_v25 = vadd.f32 %v69_v21, %v54_v23  ;;  %v56_v30 = vmul.f32 %v142_v19, %v45_v20 }
  0x88   :  { %v86_v31 = vmax.f32 %v82_v25, 0.0 }
  0x89   :  { %v79_v26 = vpop.permute.xlu1 %78  ;;  %v74_v27 = vpop.permute.xlu0 %73 }
  0x8a   :  { %v83_v32 = vadd.f32 %v74_v27, %v55_v28  ;;  %v84_v35 = vadd.f32 %v79_v26, %v56_v30 }
  0x8c   :  { %v87_v38 = vmax.f32 %v83_v32, 0.0  ;;  %v88_v41 = vmax.f32 %v84_v35, 0.0 }
  0x8d   :  { %v101_v33 = vpop.permute.xlu1 %100  ;;  %v96_v34 = vpop.permute.xlu0 %95 }
  0x8e   :  { %v114_v36 = vmul.f32 %v101_v33, %v86_v31  ;;  %v113_v37 = vmul.f32 %v96_v34, %v85_v29 }
  0x90   :  { %v117_v42 = vadd.f32 %v114_v36, %v113_v37 }
  0x91   :  { %v111_v39 = vpop.permute.xlu1 %110  ;;  %v106_v40 = vpop.permute.xlu0 %105 }
  0x92   :  { %v115_v43 = vmul.f32 %v106_v40, %v87_v38  ;;  %v116_v44 = vmul.f32 %v111_v39, %v88_v41 }
  0x94   :  { %v118_v45 = vadd.f32 %v117_v42, %v115_v43 }
  0x95   :  { %v130_v54 = vpop.permute.xlu0 %129 }
  0x96   :  { %v119_v46 = vadd.f32 %v118_v45, %v116_v44  ;;  %v135_v57 = vrot.slane %v130_v54, %v134_v52 }
  0x98   :  { %v120_v48 = vrot.slane %v119_v46, 4 }
  0x9a   :  { %v121_v49 = vadd.f32 %v120_v48, %v119_v46 }
  0x9c   :  { %v122_v51 = vrot.slane %v121_v49, 2 }
  0x9e   :  { %v123_v53 = vadd.f32 %v122_v51, %v121_v49 }
  0xa0   :  { %v124_v55 = vrot.slane %v123_v53, 1 }
  0xa2   :  { %v125_v56 = vadd.f32 %v124_v55, %v123_v53 }
  0xa4   :  { %v136_v58 = vadd.f32 %v135_v57, %v125_v56 }
  0xa6   :  { %137 = vst [vmem:[%s227_s5] sm:$0x1] %v136_v58 }

</bundles_post_ra>
